<compile_context>
chip_gen: v7x
topology: tpu7x:2x2x1
jax: 0.10.0
libtpu: 0.0.40
codegen_flags: <defaults>
</compile_context>

<pallas_src>
import functools

import jax
import jax.numpy as jnp
from jax.experimental import pallas as pl
from jax.experimental.pallas import tpu as pltpu


def fmoe_expert_kernel(cnt_ref, cw_ref, x_ref, w1t_ref, b1_ref, w2t_ref, b2_ref,
                       o_ref, acc_ref, *, num_experts):
    """Grid = (token_tiles, experts, hidden_tiles).

    For one (token tile, expert) pair the kernel streams TH-wide slices of the
    two expert weight matrices, accumulating the expert MLP output in a
    resident f32 scratch; at the last hidden slice the expert output is scaled
    by the per-token combine weight and added into the resident output block.
    Expert/tile pairs with zero routed tokens skip all MXU/VPU work.
    """
    t = pl.program_id(0)
    e = pl.program_id(1)
    h = pl.program_id(2)
    nh = pl.num_programs(2)

    # Output block is resident for the whole token tile (t is outermost):
    # zero it once, then accumulate every routed expert's contribution.
    @pl.when(jnp.logical_and(e == 0, h == 0))
    def _init_out():
        o_ref[...] = jnp.zeros_like(o_ref)

    cnt = cnt_ref[t * num_experts + e]          # routed tokens in this (tile, expert)

    @pl.when(cnt > 0)
    def _routed():
        x = x_ref[...]                                              # (TB, D) bf16
        # htoh4 slice: (TB, D) @ (D, TH) + b1 -> relu  (f32 accumulation on MXU)
        hid = jnp.dot(x, w1t_ref[...],
                      preferred_element_type=jnp.float32) + b1_ref[...]
        hid = jnp.maximum(hid, 0.0).astype(x.dtype)                 # bf16 for 2nd pass
        # h4toh slice: (TB, TH) @ (TH, D), accumulated in f32
        part = jnp.dot(hid, w2t_ref[...], preferred_element_type=jnp.float32)

        @pl.when(h == 0)
        def _first():                       # fused init: no separate zero pass
            acc_ref[...] = part

        @pl.when(h != 0)
        def _rest():
            acc_ref[...] += part

        @pl.when(h == nh - 1)
        def _combine():
            # w_e == 0 contributes exactly 0 (acc + b2 is finite f32): no guard.
            o_ref[...] += cw_ref[...] * (acc_ref[...] + b2_ref[...])


def fmoe_prepare_params(w1, b1, w2, b2):
    """One-time parameter prep (hoisted out of the forward path).

    PyTorch layout (out, in) -> (in, out); weights stored bf16 for the MXU
    stream, biases f32 (they join the f32 accumulation).
    """
    E, H, D = w1.shape
    return {
        "w1t": jnp.transpose(w1, (0, 2, 1)).astype(jnp.bfloat16),   # (E, D, H)
        "b1r": b1.reshape(E, 1, H).astype(jnp.float32),
        "w2t": jnp.transpose(w2, (0, 2, 1)).astype(jnp.bfloat16),   # (E, H, D)
        "b2r": b2.reshape(E, 1, D).astype(jnp.float32),
    }


def _largest_tile(total, preferred):
    """Largest divisor of `total` that is <= preferred."""
    t = max(1, min(total, preferred))
    while total % t:
        t -= 1
    return t


def fmoe_forward(x, gate_w, gate_b, params, *, top_k, tb=None, th=None,
                 vmem_limit_bytes=None):
    """x: (B, D) tokens; params from fmoe_prepare_params (expert weights)."""
    B, D = x.shape
    w1t, b1r, w2t, b2r = params["w1t"], params["b1r"], params["w2t"], params["b2r"]
    E, _, H = w1t.shape

    # --- gate (NaiveGate): linear -> top_k -> softmax over selected scores (f32) ---
    logits = (x.astype(jnp.float32) @ gate_w.astype(jnp.float32).T
              + gate_b.astype(jnp.float32))
    vals, idx = jax.lax.top_k(logits, top_k)                        # (B, top_k)
    score = jax.nn.softmax(vals, axis=-1)                           # (B, top_k)
    # dense combine-weight matrix (B, E): score scattered onto selected experts
    cw = jnp.zeros((B, E), jnp.float32).at[
        jnp.arange(B)[:, None], idx].add(score)
    cw_t = cw.T.reshape(E, B, 1)                                    # expert-major column

    # --- tile sizes ---
    if tb is None:
        tb = _largest_tile(B, 512)          # big tile amortizes weight streaming
        if B // tb < 2:                     # but keep >=2 tiles for megacore (v7x)
            half = _largest_tile(B, max(tb // 2, 1))
            if half >= 8:
                tb = half
    if th is None:
        th = _largest_tile(H, 256)          # fits v7x 64 MiB VMEM comfortably
    assert B % tb == 0 and H % th == 0, "token/hidden dims must divide tiles"
    nT = B // tb

    # per-(token_tile, expert) routed-token counts (scalar-prefetched into SMEM)
    routed = jnp.zeros((B, E), jnp.int32).at[jnp.arange(B)[:, None], idx].set(1)
    counts = routed.reshape(nT, tb, E).sum(axis=1).reshape(-1).astype(jnp.int32)

    x_bf = x.astype(jnp.bfloat16)

    # --- VMEM budget derived from the actual buffer footprint ---
    if vmem_limit_bytes is None:
        w_slice = D * th * 2                                        # one bf16 weight slice
        buf = (2 * 2 * w_slice              # W1^T and W2^T slices, double-buffered
               + 2 * tb * D * 2             # x tile (bf16), double-buffered
               + 2 * tb * D * 4             # out tile (f32), double-buffered
               + tb * D * 4)                # resident f32 accumulator
        # clamp below v7x's 64 MiB physical VMEM; pass explicitly for bigger
        # tiles on v5e/v6e (128 MiB VMEM).
        vmem_limit_bytes = min(max(int(buf * 1.6) + (2 << 20), 24 << 20), 56 << 20)

    # advisory cost: routed flops (two matmuls), weight + activation traffic
    flops = 4 * B * top_k * D * H
    bytes_accessed = nT * E * 4 * D * H + B * D * 2 + B * D * 4 + B * E * 4

    grid = (nT, E, H // th)
    kernel = functools.partial(fmoe_expert_kernel, num_experts=E)

    out = pl.pallas_call(
        kernel,
        out_shape=jax.ShapeDtypeStruct((B, D), jnp.float32),
        grid_spec=pltpu.PrefetchScalarGridSpec(
            num_scalar_prefetch=1,          # routed counts -> SMEM
            grid=grid,
            in_specs=[
                # combine weight column for expert e / token tile t
                pl.BlockSpec((pl.Squeezed(), tb, 1), lambda t, e, h, cnt: (e, t, 0)),
                # token tile (bf16) -- constant across (e, h), fetched once per t
                pl.BlockSpec((tb, D), lambda t, e, h, cnt: (t, 0)),
                # W1^T hidden slice (D, TH)
                pl.BlockSpec((pl.Squeezed(), D, th), lambda t, e, h, cnt: (e, 0, h)),
                # b1 hidden slice (1, TH)
                pl.BlockSpec((pl.Squeezed(), 1, th), lambda t, e, h, cnt: (e, 0, h)),
                # W2^T hidden slice (TH, D)
                pl.BlockSpec((pl.Squeezed(), th, D), lambda t, e, h, cnt: (e, h, 0)),
                # b2 (1, D)
                pl.BlockSpec((pl.Squeezed(), 1, D), lambda t, e, h, cnt: (e, 0, 0)),
            ],
            out_specs=pl.BlockSpec((tb, D), lambda t, e, h, cnt: (t, 0)),
            scratch_shapes=[pltpu.VMEM((tb, D), jnp.float32)],
        ),
        compiler_params=pltpu.CompilerParams(
            dimension_semantics=("parallel", "arbitrary", "arbitrary"),
            vmem_limit_bytes=vmem_limit_bytes,
        ),
        cost_estimate=pl.CostEstimate(flops=flops, transcendentals=0,
                                      bytes_accessed=bytes_accessed),
    )(counts, cw_t, x_bf, w1t, b1r, w2t, b2r)
    return out


def fmoe_reference(x, gate_w, gate_b, w1, b1, w2, b2, *, top_k):
    """Pure-JAX f32 reference mirroring the PyTorch FMoE forward."""
    logits = x @ gate_w.T + gate_b
    vals, idx = jax.lax.top_k(logits, top_k)
    score = jax.nn.softmax(vals, axis=-1)                           # (B, top_k)
    h = jnp.maximum(jnp.einsum('bd,ehd->beh', x, w1) + b1[None], 0.0)
    y = jnp.einsum('beh,edh->bed', h, w2) + b2[None]                # (B, E, D)
    y_sel = jnp.take_along_axis(y, idx[:, :, None], axis=1)         # (B, top_k, D)
    return jnp.einsum('bk,bkd->bd', score, y_sel)


if __name__ == "__main__":
    # Small, MoE-consistent shapes that still exercise the tiling:
    # 16 tokens (batch=2 x seq=8), d_model=128, num_expert=4, top_k=2,
    # hidden = 4*d_model = 512; default tiles tb=8, th=256 -> grid (2, 4, 2).
    B, D, E, TOPK = 16, 128, 4, 2
    H = 4 * D

    key = jax.random.PRNGKey(0)
    k = jax.random.split(key, 7)
    x = jax.random.normal(k[0], (B, D), jnp.float32)
    gate_w = jax.random.normal(k[1], (E, D), jnp.float32) * 0.1
    gate_b = jax.random.normal(k[2], (E,), jnp.float32) * 0.01
    w1 = jax.random.normal(k[3], (E, H, D), jnp.float32) * (1.0 / D ** 0.5)
    b1 = jax.random.normal(k[4], (E, H), jnp.float32) * 0.01
    w2 = jax.random.normal(k[5], (E, D, H), jnp.float32) * (1.0 / H ** 0.5)
    b2 = jax.random.normal(k[6], (E, D), jnp.float32) * 0.01

    # One-time parameter prep (transpose + bf16 cast hoisted out of forward).
    params = jax.tree_util.tree_map(jax.block_until_ready,
                                    fmoe_prepare_params(w1, b1, w2, b2))

    out = fmoe_forward(x, gate_w, gate_b, params, top_k=TOPK)
    out = jax.block_until_ready(out)

    ref = fmoe_reference(x, gate_w, gate_b, w1, b1, w2, b2, top_k=TOPK)
    assert out.shape == (B, D)
    # bf16 weight/activation streaming (f32 accumulation) -> looser tolerance
    assert jnp.allclose(out, ref, atol=5e-2, rtol=5e-2), "mismatch vs reference"

    print("KERNEL_OK")
</pallas_src>

<mosaic_0001>
module attributes {stable_mosaic.version = 11 : i64} {
  func.func @fmoe_expert_kernel(%arg0: i32, %arg1: i32, %arg2: i32, %arg3: memref<8xi32, #tpu.memory_space<smem>>, %arg4: memref<1x8x1xf32, #tpu.memory_space<vmem>>, %arg5: memref<8x128xbf16, #tpu.memory_space<vmem>>, %arg6: memref<1x128x256xbf16, #tpu.memory_space<vmem>>, %arg7: memref<1x1x256xf32, #tpu.memory_space<vmem>>, %arg8: memref<1x256x128xbf16, #tpu.memory_space<vmem>>, %arg9: memref<1x1x128xf32, #tpu.memory_space<vmem>>, %arg10: memref<8x128xf32, #tpu.memory_space<vmem>>, %arg11: memref<8x128xf32, #tpu.memory_space<vmem>>) attributes {dimension_semantics = [#tpu.dimension_semantics<parallel>, #tpu.dimension_semantics<arbitrary>, #tpu.dimension_semantics<arbitrary>], iteration_bounds = array<i64: 2, 4, 2>, scalar_prefetch = 1 : i64, scratch_operands = 1 : i64, tpu.core_type = #tpu.core_type<tc>, window_params = [{transform_indices = @transform_0, window_bounds = array<i64: 1, 8, 1>}, {transform_indices = @transform_1, window_bounds = array<i64: 8, 128>}, {transform_indices = @transform_2, window_bounds = array<i64: 1, 128, 256>}, {transform_indices = @transform_3, window_bounds = array<i64: 1, 1, 256>}, {transform_indices = @transform_4, window_bounds = array<i64: 1, 256, 128>}, {transform_indices = @transform_5, window_bounds = array<i64: 1, 1, 128>}, {transform_indices = @transform_6, window_bounds = array<i64: 8, 128>}]} {
    %c0_i32 = arith.constant 0 : i32
    %0 = arith.cmpi eq, %arg1, %c0_i32 : i32
    %c0_i32_0 = arith.constant 0 : i32
    %1 = arith.cmpi eq, %arg2, %c0_i32_0 : i32
    %2 = arith.andi %0, %1 : i1
    %3 = arith.extui %2 : i1 to i32
    %c0_i32_1 = arith.constant 0 : i32
    %4 = arith.cmpi ne, %3, %c0_i32_1 : i32
    scf.if %4 {
      %cst = arith.constant 0.000000e+00 : f32
      %12 = vector.broadcast %cst : f32 to vector<8x128xf32>
      %c0 = arith.constant 0 : index
      %c0_4 = arith.constant 0 : index
      %13 = vector.load %arg10[%c0, %c0_4] : memref<8x128xf32, #tpu.memory_space<vmem>>, vector<8x128xf32>
      tpu.vector_store %arg10[%c0, %c0_4], %12 {strides = array<i32>} : memref<8x128xf32, #tpu.memory_space<vmem>>, vector<8x128xf32>,
    } else {
    }
    %c4_i32 = arith.constant 4 : i32
    %5 = arith.muli %arg0, %c4_i32 : i32
    %6 = arith.addi %5, %arg1 : i32
    %7 = arith.index_cast %6 : i32 to index
    %8 = memref.load %arg3[%7] : memref<8xi32, #tpu.memory_space<smem>>
    %c0_i32_2 = arith.constant 0 : i32
    %9 = arith.cmpi sgt, %8, %c0_i32_2 : i32
    %10 = arith.extui %9 : i1 to i32
    %c0_i32_3 = arith.constant 0 : i32
    %11 = arith.cmpi ne, %10, %c0_i32_3 : i32
    scf.if %11 {
      %c0 = arith.constant 0 : index
      %c0_4 = arith.constant 0 : index
      %12 = vector.load %arg5[%c0, %c0_4] : memref<8x128xbf16, #tpu.memory_space<vmem>>, vector<8x128xbf16>
      %c0_5 = arith.constant 0 : index
      %c0_6 = arith.constant 0 : index
      %c0_7 = arith.constant 0 : index
      %13 = vector.load %arg6[%c0_5, %c0_6, %c0_7] : memref<1x128x256xbf16, #tpu.memory_space<vmem>>, vector<1x128x256xbf16>
      %14 = vector.shape_cast %13 : vector<1x128x256xbf16> to vector<128x256xbf16>
      %cst = arith.constant dense<0.000000e+00> : vector<8x256xf32>
      %15 = tpu.matmul %12, %14, %cst {dimension_numbers = #tpu.dot_dimension_numbers<[1], [0], [0], [1], [0, 0, 1, 1], [], []>} : vector<8x128xbf16>, vector<128x256xbf16>, vector<8x256xf32> -> vector<8x256xf32>
      %c0_8 = arith.constant 0 : index
      %c0_9 = arith.constant 0 : index
      %c0_10 = arith.constant 0 : index
      %16 = vector.load %arg7[%c0_8, %c0_9, %c0_10] : memref<1x1x256xf32, #tpu.memory_space<vmem>>, vector<1x1x256xf32>
      %17 = vector.shape_cast %16 : vector<1x1x256xf32> to vector<1x256xf32>
      %18 = vector.broadcast %17 : vector<1x256xf32> to vector<8x256xf32>
      %19 = arith.addf %15, %18 : vector<8x256xf32>
      %cst_11 = arith.constant 0.000000e+00 : f32
      %20 = vector.broadcast %cst_11 : f32 to vector<8x256xf32>
      %21 = arith.maximumf %19, %20 : vector<8x256xf32>
      %22 = arith.truncf %21 : vector<8x256xf32> to vector<8x256xbf16>
      %c0_12 = arith.constant 0 : index
      %c0_13 = arith.constant 0 : index
      %c0_14 = arith.constant 0 : index
      %23 = vector.load %arg8[%c0_12, %c0_13, %c0_14] : memref<1x256x128xbf16, #tpu.memory_space<vmem>>, vector<1x256x128xbf16>
      %24 = vector.shape_cast %23 : vector<1x256x128xbf16> to vector<256x128xbf16>
      %cst_15 = arith.constant dense<0.000000e+00> : vector<8x128xf32>
      %25 = tpu.matmul %22, %24, %cst_15 {dimension_numbers = #tpu.dot_dimension_numbers<[1], [0], [0], [1], [0, 0, 1, 1], [], []>} : vector<8x256xbf16>, vector<256x128xbf16>, vector<8x128xf32> -> vector<8x128xf32>
      %c0_i32_16 = arith.constant 0 : i32
      %26 = arith.cmpi eq, %arg2, %c0_i32_16 : i32
      %27 = arith.extui %26 : i1 to i32
      %c0_i32_17 = arith.constant 0 : i32
      %28 = arith.cmpi ne, %27, %c0_i32_17 : i32
      scf.if %28 {
        %c0_21 = arith.constant 0 : index
        %c0_22 = arith.constant 0 : index
        %35 = vector.load %arg11[%c0_21, %c0_22] : memref<8x128xf32, #tpu.memory_space<vmem>>, vector<8x128xf32>
        tpu.vector_store %arg11[%c0_21, %c0_22], %25 {strides = array<i32>} : memref<8x128xf32, #tpu.memory_space<vmem>>, vector<8x128xf32>,
      } else {
      }
      %c0_i32_18 = arith.constant 0 : i32
      %29 = arith.cmpi ne, %arg2, %c0_i32_18 : i32
      %30 = arith.extui %29 : i1 to i32
      %c0_i32_19 = arith.constant 0 : i32
      %31 = arith.cmpi ne, %30, %c0_i32_19 : i32
      scf.if %31 {
        %c0_21 = arith.constant 0 : index
        %c0_22 = arith.constant 0 : index
        %35 = vector.load %arg11[%c0_21, %c0_22] : memref<8x128xf32, #tpu.memory_space<vmem>>, vector<8x128xf32>
        %36 = arith.addf %35, %25 : vector<8x128xf32>
        %c0_23 = arith.constant 0 : index
        %c0_24 = arith.constant 0 : index
        %37 = vector.load %arg11[%c0_23, %c0_24] : memref<8x128xf32, #tpu.memory_space<vmem>>, vector<8x128xf32>
        tpu.vector_store %arg11[%c0_23, %c0_24], %36 {strides = array<i32>} : memref<8x128xf32, #tpu.memory_space<vmem>>, vector<8x128xf32>,
      } else {
      }
      %c1_i32 = arith.constant 1 : i32
      %32 = arith.cmpi eq, %arg2, %c1_i32 : i32
      %33 = arith.extui %32 : i1 to i32
      %c0_i32_20 = arith.constant 0 : i32
      %34 = arith.cmpi ne, %33, %c0_i32_20 : i32
      scf.if %34 {
        %c0_21 = arith.constant 0 : index
        %c0_22 = arith.constant 0 : index
        %35 = vector.load %arg10[%c0_21, %c0_22] : memref<8x128xf32, #tpu.memory_space<vmem>>, vector<8x128xf32>
        %c0_23 = arith.constant 0 : index
        %c0_24 = arith.constant 0 : index
        %c0_25 = arith.constant 0 : index
        %36 = vector.load %arg4[%c0_23, %c0_24, %c0_25] : memref<1x8x1xf32, #tpu.memory_space<vmem>>, vector<1x8x1xf32>
        %37 = vector.shape_cast %36 : vector<1x8x1xf32> to vector<8x1xf32>
        %c0_26 = arith.constant 0 : index
        %c0_27 = arith.constant 0 : index
        %38 = vector.load %arg11[%c0_26, %c0_27] : memref<8x128xf32, #tpu.memory_space<vmem>>, vector<8x128xf32>
        %c0_28 = arith.constant 0 : index
        %c0_29 = arith.constant 0 : index
        %c0_30 = arith.constant 0 : index
        %39 = vector.load %arg9[%c0_28, %c0_29, %c0_30] : memref<1x1x128xf32, #tpu.memory_space<vmem>>, vector<1x1x128xf32>
        %40 = vector.shape_cast %39 : vector<1x1x128xf32> to vector<1x128xf32>
        %41 = vector.broadcast %40 : vector<1x128xf32> to vector<8x128xf32>
        %42 = arith.addf %38, %41 : vector<8x128xf32>
        %43 = vector.broadcast %37 : vector<8x1xf32> to vector<8x128xf32>
        %44 = arith.mulf %43, %42 : vector<8x128xf32>
        %45 = arith.addf %35, %44 : vector<8x128xf32>
        %c0_31 = arith.constant 0 : index
        %c0_32 = arith.constant 0 : index
        %46 = vector.load %arg10[%c0_31, %c0_32] : memref<8x128xf32, #tpu.memory_space<vmem>>, vector<8x128xf32>
        tpu.vector_store %arg10[%c0_31, %c0_32], %45 {strides = array<i32>} : memref<8x128xf32, #tpu.memory_space<vmem>>, vector<8x128xf32>,
      } else {
      }
    } else {
    }
    return
  }
  func.func @transform_0(%arg0: i32, %arg1: i32, %arg2: i32, %arg3: memref<8xi32, #tpu.memory_space<smem>>) -> (i32, i32, i32) {
    %c0_i32 = arith.constant 0 : i32
    %c0_i32_0 = arith.constant 0 : i32
    return %arg1, %arg0, %c0_i32 : i32, i32, i32
  }
  func.func @transform_1(%arg0: i32, %arg1: i32, %arg2: i32, %arg3: memref<8xi32, #tpu.memory_space<smem>>) -> (i32, i32) {
    %c0_i32 = arith.constant 0 : i32
    %c0_i32_0 = arith.constant 0 : i32
    return %arg0, %c0_i32 : i32, i32
  }
  func.func @transform_2(%arg0: i32, %arg1: i32, %arg2: i32, %arg3: memref<8xi32, #tpu.memory_space<smem>>) -> (i32, i32, i32) {
    %c0_i32 = arith.constant 0 : i32
    %c0_i32_0 = arith.constant 0 : i32
    return %arg1, %c0_i32, %arg2 : i32, i32, i32
  }
  func.func @transform_3(%arg0: i32, %arg1: i32, %arg2: i32, %arg3: memref<8xi32, #tpu.memory_space<smem>>) -> (i32, i32, i32) {
    %c0_i32 = arith.constant 0 : i32
    %c0_i32_0 = arith.constant 0 : i32
    return %arg1, %c0_i32, %arg2 : i32, i32, i32
  }
  func.func @transform_4(%arg0: i32, %arg1: i32, %arg2: i32, %arg3: memref<8xi32, #tpu.memory_space<smem>>) -> (i32, i32, i32) {
    %c0_i32 = arith.constant 0 : i32
    %c0_i32_0 = arith.constant 0 : i32
    return %arg1, %arg2, %c0_i32 : i32, i32, i32
  }
  func.func @transform_5(%arg0: i32, %arg1: i32, %arg2: i32, %arg3: memref<8xi32, #tpu.memory_space<smem>>) -> (i32, i32, i32) {
    %c0_i32 = arith.constant 0 : i32
    %c0_i32_0 = arith.constant 0 : i32
    %c0_i32_1 = arith.constant 0 : i32
    return %arg1, %c0_i32, %c0_i32_0 : i32, i32, i32
  }
  func.func @transform_6(%arg0: i32, %arg1: i32, %arg2: i32, %arg3: memref<8xi32, #tpu.memory_space<smem>>) -> (i32, i32) {
    %c0_i32 = arith.constant 0 : i32
    %c0_i32_0 = arith.constant 0 : i32
    return %arg0, %c0_i32 : i32, i32
  }
}

</mosaic_0001>

<bundles_post_ra>
// kernel: tpu_custom_call.1
= control target key start
LH: loop header
LB: loop body
LE: loop exit
PB: predicated region body
PF: predicated region fallthrough
CT: control target
= control target key end

     0   :  { %s1923_s0 = inlined_call_operand.vmem [shape: s32[8], index: 0, kind: input, shape index: {}]   ;;  %s1924_s1 = inlined_call_operand.vmem [shape: f32[4,16,1], index: 1, kind: input, shape index: {}]   ;;  %s1925_s2 = inlined_call_operand.vmem [shape: bf16[16,128], index: 2, kind: input, shape index: {}]   ;;  %s1926_s3 = inlined_call_operand.hbm [shape: bf16[4,128,512], index: 3, kind: input, shape index: {}]   ;;  %s1927_s4 = inlined_call_operand.vmem [shape: f32[4,1,512], index: 4, kind: input, shape index: {}]   ;;  %s1928_s5 = inlined_call_operand.hbm [shape: bf16[4,512,128], index: 5, kind: input, shape index: {}]   ;;  %s1929_s6 = inlined_call_operand.vmem [shape: f32[4,1,128], index: 6, kind: input, shape index: {}]   ;;  %s1930_s7 = inlined_call_operand.hbm [shape: f32[16,128], index: 7, kind: output, shape index: {}]  }
   0x1   :  { %1946 = sst [smem:[#allocation26_spill]] %s1926_s3  ;;  %s12_s26 = sshll.u32 %s1923_s0, 4  ;;  %s13_s26 = int_to_ptr.vmem [resolvable:$true] %s12_s26 }
   0x2   :  { %1947 = sst [smem:[#allocation27_spill]] %s1927_s4  ;;  %s1254_s27 = scalar_lea.vmem %s13_s26, 16 }
   0x3   :  { %1948 = sst [smem:[#allocation28_spill]] %s1928_s5  ;;  %p1255_p0 = scmp.ne.s32.totalorder %s13_s26, %s1254_s27 }
   0x4   :  { %1949 = sst [smem:[#allocation29_spill]] %s1929_s6  ;;  %p1259_p1 = scmp.lt.s32.totalorder %s13_s26, %s13_s26 }
   0x5   :  { %1950 = sst [smem:[#allocation30_spill]] %s1930_s7  ;;  %p1260_p2 = scmp.lt.s32.totalorder %s1254_s27, %s1254_s27 }
   0x7   :  { %p1261_p3 = por %p1260_p2, %p1259_p1 }
   0x9   :  { %p1262_p4 = pnand %p1261_p3, %p1255_p0 }
   0xb   :  { %1265 = shalt.err (!%p1262_p4)  }
   0xc   :  { %s1472_s28 = smov [#allocation4]  }
   0xd   :  { %15 = dma.vmem_to_smem %s13_s26, 16, %s1472_s28, [#allocation3] }
   0xe   :  { %1406 = dma.done.wait [#allocation3], 16 }
   0xf   :  { %1407 = vsyncadd [#allocation3], 4294967280 }
  0x10   :  { %17 = sfence }
  0x11   :  { %18 = vsyncpa [#allocation6], 0 }
  0x12   :  { %20 = vsyncpa [#allocation6 + $0x1], 0 }
  0x13   :  { %21 = vsyncpa [#allocation9], 0 }
  0x14   :  { %23 = vsyncpa [#allocation9 + $0x1], 0 }
  0x15   :  { %24 = vsyncpa [#allocation7], 0 }
  0x16   :  { %26 = vsyncpa [#allocation7 + $0x1], 0  ;;  %s1527_s0 = smov 0   ;;  %s1529_s29 = smov 0  }
  0x17   :  { %s1531_s30 = smov 0   ;;  %s1533_s8 = smov 0  }
  0x18   :  { %s1535_s9 = smov 0   ;;  %s1537_s10 = smov 0  }
  0x19   :  { %s1539_s11 = smov 0   ;;  %s1541_s12 = smov 0  }
  0x1a   :  { %s1543_s13 = smov 0   ;;  %s1545_s14 = smov 0  }
  0x1b   :  { %s1547_s15 = smov 0   ;;  %s1549_s16 = smov 0  }
  0x1c   :  { %s1551_s17 = smov 0  }
  0x1d LB: > { %1951 = sst [smem:[#allocation15_spill]] %s1422_s0  ;;  %s996_s18 = sadd.s32 4294967295, %s1470_s17   ;;  %s1470_s17 = sphi %s1551_s17, %s32_s17   ;;  %s1466_s16 = sphi %s1549_s16, %s2001_s16   ;;  %s1462_s15 = sphi %s1547_s15, %s2000_s15   ;;  %s1458_s14 = sphi %s1545_s14, %s1999_s14   ;;  %s1454_s13 = sphi %s1543_s13, %s1989_s13   ;;  %s1450_s12 = sphi %s1541_s12, %s1998_s12   ;;  %s1446_s11 = sphi %s1539_s11, %s1997_s11   ;;  %s1442_s10 = sphi %s1537_s10, %s1988_s10   ;;  %s1438_s9 = sphi %s1535_s9, %s1996_s9   ;;  %s1434_s8 = sphi %s1533_s8, %s1995_s8   ;;  %s1430_s30 = sphi %s1531_s30, %s1986_s30   ;;  %s1426_s29 = sphi %s1529_s29, %s1994_s29   ;;  %s1422_s0 = sphi %s1527_s0, %s1993_s0  }
  0x1e   : > { %1952 = sst [smem:[#allocation16_spill]] %s1430_s30  ;;  %s44_s20 = sadd.s32 1, %s1458_s14 }
  0x1f   : > { %1953 = sst [smem:[#allocation17_spill]] %s1442_s10  ;;  %s47_s21 = sadd.s32 1, %s1462_s15 }
  0x20   : > { %1954 = sst [smem:[#allocation18_spill]] %s1466_s16  ;;  %p45_p5 = scmp.ge.s32.totalorder %s44_s20, 2 }
  0x21   : > { %s51_s22 = sadd.s32 1, %s1466_s16  ;;  %s114_s23 = sadd.s32 1, %s1442_s10 }
  0x22   : > { %p121_p6 = scmp.ne.s32.totalorder %s1442_s10, %s1438_s9  ;;  %s2003_s20 = smov (%p45_p5, %s44_s20), 0 }
  0x23   : > { %1955 = sst [smem:[#allocation19_spill]] %s2003_s20  ;;  %s2005_s21 = smov (!%p45_p5, %s47_s21), %s1462_s15 }
  0x24   : > { %s110_s24 = ssub.s32 %s1458_s14, %s2003_s20  ;;  %p122_p7 = scmp.eq.s32.totalorder %s1470_s17, 0 }
  0x25   : > { %p49_p8 = scmp.ge.s32.totalorder %s2005_s21, 4  ;;  %p127_p9 = scmp.ne.s32.totalorder %s1438_s9, %s1434_s8 }
  0x26   : > { %p1608_p10 = por %p122_p7, %p121_p6  ;;  %p128_p11 = scmp.eq.s32.totalorder %s996_s18, 0 }
  0x27   : > { %s2007_s21 = smov (%p49_p8, %s2005_s21), 0  ;;  %s2009_s22 = smov (!%p49_p8, %s51_s22), %s1466_s16 }
  0x28   : > { %1957 = sst [smem:[#allocation20_spill]] %s2007_s21  ;;  %s109_s26 = ssub.s32 %s1462_s15, %s2007_s21 }
  0x29   : > { %p1617_p12 = por %p128_p11, %p127_p9  ;;  %p53_p13 = scmp.ge.s32.totalorder %s2009_s22, 2 }
  0x2a   : > { %s111_s28 = sor.u32 %s110_s24, %s109_s26  ;;  %s222_s8 = sadd.s32 1, %s1430_s30 }
  0x2b   : > { %s1958_s27 = scalar_select %p1617_p12, 1, 0 }
  0x2c   : > { %p112_p0 = scmp.eq.s32.totalorder %s111_s28, 0  ;;  %s2011_s22 = smov (%p53_p13, %s2009_s22), 0 }
  0x2d   : > { %1959 = sst [smem:[#allocation21_spill]] %s2011_s22  ;;  %s219_s20 = ssub.s32 %s1466_s16, %s2011_s22 }
  0x2e   : > { %s1625_s19 = scalar_select %p112_p0, %s1442_s10, %s114_s23  }
  0x2f   : > { %p232_p1 = scmp.ne.s32.totalorder %s1430_s30, %s1426_s29  ;;  %p220_p2 = scmp.eq.s32.totalorder %s219_s20, 0 }
  0x30   : > { %1960 = sst [smem:[#allocation22_spill]] %s1625_s19  ;;  %p233_p3 = scmp.eq.s32.totalorder %s996_s18, 15 }
  0x31   : > { %p238_p4 = scmp.ne.s32.totalorder %s1426_s29, %s1422_s0  ;;  %s1961_s21 = sadd.s32 4294967294, %s1470_s17  }
  0x32   : > { %p239_p5 = scmp.eq.s32.totalorder %s1961_s21, 15  ;;  %p1638_p6 = por %p233_p3, %p232_p1 }
  0x33   : > { %s1636_s7 = scalar_select %p220_p2, %s1430_s30, %s222_s8  }
  0x34   : > { %s1963_s24 = scalar_select %p1638_p6, 1, 0 }
  0x35   : > { %1962 = sst [smem:[#allocation23_spill]] %s1636_s7  ;;  %p1642_p7 = por %p239_p5, %p238_p4 }
  0x36   : > { %1964 = sst [smem:[#allocation24_spill]] %s1963_s24  ;;  %p1098_p8 = scmp.lt.s32.totalorder %s1470_s17, 16 }
  0x37   : > { %s1965_s26 = scalar_select %p1642_p7, 1, 0 }
  0x38   : > { %s1648_s23 = sand.u32 1, %s1442_s10   ;;  %s1001_s18 = sshll.u32 %s1458_s14, 1 }
  0x39   : > { %1966 = sst [smem:[#allocation25_spill]] %s1965_s26  ;;  %s1938_s20 = sshll.u32 %s1648_s23, 7 }
  0x3a   : > { %s1002_s28 = sshll.u32 %s1462_s15, 6  ;;  %s281_s8 = scalar_lea.vmem [#allocation5], %s1938_s20 }
  0x3b   : > { %s287_s21 = sadd.s32 %s1002_s28, %s1001_s18  ;;  %s290_s22 = sshll.u32 %s281_s8, 4  ;;  %s1657_s22 = int_to_ptr.vmem [resolvable:$true] %s290_s22 }
  0x3c   : > { %s1003_s16 = sshll.u32 %s287_s21, 6  ;;  %s1967_s3 = sld [smem:[#allocation26_spill]] }
  0x3d   : > { %p1666_p9 = pnand %p1098_p8, %p1608_p10  ;;  %s278_s18 = scalar_lea.sflag [#allocation6], %s1648_s23 }
  0x3f   : > { %p1268_p13 = pneg %p1666_p9 }
  0x42   : > { %s1662_s30 = scalar_lea.hbm %s1967_s3, %s1003_s16  ;;  %s1271_s19 = scalar_lea.hbm %s1967_s3, 16384 }
  0x43   : > { %s1266_s21 = scalar_lea.hbm %s1662_s30, 2048  ;;  %p1272_p10 = scmp.lt.u32.totalorder %s1662_s30, %s1967_s3 }
  0x44   : > { %p1267_p11 = scmp.ne.s32.totalorder %s1662_s30, %s1266_s21  ;;  %p1273_p2 = scmp.lt.u32.totalorder %s1271_s19, %s1266_s21 }
  0x45   : > { %p1275_p4 = scmp.lt.u32.totalorder %s1266_s21, %s1662_s30 }
  0x46   : > { %p1269_p0 = pnand %p1268_p13, %p1267_p11  ;;  %p1274_p3 = por %p1273_p2, %p1272_p10 }
  0x48   : > { %p1270_p1 = pneg %p1269_p0  ;;  %p1276_p5 = por %p1275_p4, %p1274_p3 }
  0x4a   : > { %p1277_p8 = pnand %p1276_p5, %p1270_p1 }
  0x4c   : > { %1280 = shalt.err (!%p1277_p8)
}
  0x4d   : > { %s1281_s20 = scalar_lea.vmem %s1657_s22, 2048  ;;  %s1473_s7 = smov [#allocation5]  }
  0x4e   : > { %p1282_p11 = scmp.ne.s32.totalorder %s1657_s22, %s1281_s20  ;;  %s1286_s16 = sshll.u32 %s1473_s7, 4  ;;  %s1287_s16 = int_to_ptr.vmem [resolvable:$false] %s1286_s16 }
  0x4f   : > { %s1288_s25 = scalar_lea.vmem %s1287_s16, 4096  ;;  %p1289_p6 = scmp.lt.s32.totalorder %s1657_s22, %s1287_s16 }
  0x50   : > { %p1284_p0 = pnand %p1282_p11, %p1268_p13  ;;  %p1290_p10 = scmp.lt.s32.totalorder %s1288_s25, %s1281_s20 }
  0x52   : > { %p1285_p7 = pneg %p1284_p0  ;;  %p1291_p2 = por %p1290_p10, %p1289_p6 }
  0x54   : > { %p1292_p3 = pnand %p1291_p2, %p1285_p7 }
  0x56   : > { %1295 = shalt.err (!%p1292_p3)
}
  0x57   : > { %s1474_s21 = smov 256   ;;  %s1475_s19 = smov 128  }
  0x58   : > { %s1476_s8 = smov 8   ;;  %p1008_p6 = scmp.ge.s32.totalorder %s1470_s17, 1 }
  0x59   : > { %1090 = dma.hbm_to_vmem [thread:$0]  (!%p1666_p9), %s1662_s30, 2048, %s1657_s22, %s278_s18, %s1474_s21, %s1475_s19, %s1476_s8  }
  0x5a   : > { %p339_p7 = scmp.lt.s32.totalorder %s1470_s17, 17  ;;  %s1005_s7 = sshll.u32 %s1458_s14, 5 }
  0x5b   : > { %s322_s16 = sadd.s32 %s1005_s7, %s1002_s28  ;;  %s1970_s25 = sshll.u32 %s1648_s23, 7 }
  0x5c   : > { %p1700_p1 = pnand %p1008_p6, %p339_p7  ;;  %s316_s3 = scalar_lea.vmem [#allocation8], %s1970_s25 }
  0x5d   : > { %s325_s26 = sshll.u32 %s316_s3, 4  ;;  %s1007_s0 = sshll.u32 %s322_s16, 6  ;;  %s1709_s26 = int_to_ptr.vmem [resolvable:$true] %s325_s26 }
  0x5e   : > { %s1971_s5 = sld [smem:[#allocation28_spill]]  ;;  %s313_s30 = scalar_lea.sflag [#allocation9], %s1648_s23 }
  0x64   : > { %s1714_s6 = scalar_lea.hbm %s1971_s5, %s1007_s0  ;;  %s1301_s18 = scalar_lea.hbm %s1971_s5, 16384 }
  0x65   : > { %s1296_s22 = scalar_lea.hbm %s1714_s6, 2048  ;;  %p1302_p11 = scmp.lt.u32.totalorder %s1714_s6, %s1971_s5 }
  0x66   : > { %p1297_p4 = scmp.ne.s32.totalorder %s1714_s6, %s1296_s22  ;;  %p1303_p0 = scmp.lt.u32.totalorder %s1301_s18, %s1296_s22 }
  0x67   : > { %p1305_p2 = scmp.lt.u32.totalorder %s1296_s22, %s1714_s6 }
  0x68   : > { %p1299_p5 = pnand %p1297_p4, %p1268_p13  ;;  %p1304_p10 = por %p1303_p0, %p1302_p11 }
  0x6a   : > { %p1300_p8 = pneg %p1299_p5  ;;  %p1306_p3 = por %p1305_p2, %p1304_p10 }
  0x6c   : > { %p1307_p6 = pnand %p1306_p3, %p1300_p8 }
  0x6e   : > { %1310 = shalt.err (!%p1307_p6)
}
  0x6f   : > { %s1311_s4 = scalar_lea.vmem %s1709_s26, 2048  ;;  %s1477_s0 = smov [#allocation8]  }
  0x70   : > { %p1312_p7 = scmp.ne.s32.totalorder %s1709_s26, %s1311_s4  ;;  %s1316_s24 = sshll.u32 %s1477_s0, 4  ;;  %s1317_s24 = int_to_ptr.vmem [resolvable:$false] %s1316_s24 }
  0x71   : > { %s1318_s8 = scalar_lea.vmem %s1317_s24, 4096  ;;  %p1319_p12 = scmp.lt.s32.totalorder %s1709_s26, %s1317_s24 }
  0x72   : > { %p1314_p4 = pnand %p1312_p7, %p1268_p13  ;;  %p1320_p11 = scmp.lt.s32.totalorder %s1318_s8, %s1311_s4 }
  0x74   : > { %p1315_p5 = pneg %p1314_p4  ;;  %p1321_p0 = por %p1320_p11, %p1319_p12 }
  0x76   : > { %p1322_p10 = pnand %p1321_p0, %p1315_p5 }
  0x78   : > { %1325 = shalt.err (!%p1322_p10)
}
  0x79   : > { %s1478_s7 = smov 64   ;;  %s1479_s16 = smov 4  }
  0x7a   : > { %1093 = dma.hbm_to_vmem [thread:$0]  (!%p1666_p9), %s1714_s6, 2048, %s1709_s26, %s313_s30, %s1478_s7, %s1478_s7, %s1479_s16  }
  0x7b   : > { %343 = sbr.rel (%p1700_p1) target bundleno = 806 (0x326), region = 44  ;;  %s345_s25 = sand.u32 (!%p1700_p1), 1, %s1438_s9  }
  0x7c   : > { %s1009_s22 = sshll.u32 (!%p1700_p1), %s345_s25, 7  ;;  %s346_s3 = scalar_lea.sflag (!%p1700_p1), [#allocation6], %s345_s25 }
  0x7d   : > { %s1745_s28 = scalar_lea.vmem (!%p1700_p1), [#allocation5], %s1009_s22  ;;  %p1972_p12 = scmp.ne.s32.totalorder (!%p1700_p1), %s1958_s27, 0 }
  0x82   : > { %1409 = dma.done.wait (%p1972_p12), %s346_s3, 2048  }
  0x83   : > { %1411 = vsyncadd (%p1972_p12), %s346_s3, 4294965248  ;;  %s355_s18 = scalar_lea.sflag [#allocation9], %s345_s25  ;;  %s1751_s10 = scalar_lea.vmem [#allocation8], %s1009_s22 }
  0x84   : > { %1413 = dma.done.wait (%p1972_p12), %s355_s18, 2048  }
  0x85   : > { %1415 = vsyncadd (%p1972_p12), %s355_s18, 4294965248  ;;  %s1945_s6 = sand.u32 1, %s1426_s29   ;;  %p415_p9 = scmp.lt.s32.totalorder %s1450_s12, 3 }
  0x86   : > { %s1011_s26 = sshll.u32 %s1945_s6, 3  ;;  %p417_p13 = scmp.lt.s32.totalorder %s1454_s13, 1 }
  0x87   : > { %s1015_s23 = sshll.u32 %s1446_s11, 1  ;;  %s1973_s6 = sld [smem:[#allocation29_spill]] }
  0x88   : > { %s1764_s20 = scalar_select %p415_p9, %s1450_s12, 3 }
  0x89   : > { %s418_s27 = scalar_select %p417_p13, %s1454_s13, 1 }
  0x8a   : > { %s1012_s30 = sshll.u32 %s1764_s20, 1  ;;  %p431_p1 = scmp.lt.s32.totalorder %s1015_s23, 3 }
  0x8b   : > { %s420_s21 = sadd.s32 %s1012_s30, %s418_s27  ;;  %s1014_s19 = sshll.u32 %s418_s27, 2 }
  0x8c   : > { %s1013_s4 = sshll.u32 %s420_s21, 3  ;;  %s1771_s8 = scalar_lea.vmem %s1925_s2, %s1014_s19 }
  0x8d   : > { %s1776_s25 = scalar_lea.vmem %s1924_s1, %s1013_s4  ;;  %s1016_s22 = sshll.u32 %s1764_s20, 2 }
  0x8e   : > { %s2013_s23 = smov (!%p431_p1, %s1015_s23), 3  ;;  %s440_s5 = scalar_lea.vmem %s1973_s6, %s1764_s20 }
  0x8f   : > { %p442_p8 = scmp.eq.s32.totalorder %s1450_s12, 0  ;;  %s1784_s30 = sadd.s32 %s1016_s22, %s2013_s23 }
  0x90   : > { %p443_p2 = scmp.eq.s32.totalorder %s1446_s11, 0  ;;  %s1974_s19 = sld [smem:[#allocation27_spill]] }
  0x91   : > { %s1793_s24 = scalar_lea.vmem [#allocation10], %s1011_s26 }
  0x92   : > { %p444_p3 = pnand %p443_p2, %p442_p8 }
  0x93   : > { %v1480_v0 = vmov (!%p444_p3), 0.0  }
  0x94   : > { %447 = sbr.rel (%p444_p3) target bundleno = 155 (0x9b), region = 56  ;;  %448 = vst [vmem:[%s1793_s24] sm:$0xff] (!%p444_p3), %v1480_v0 }
  0x96   : > { %s435_s0 = scalar_lea.vmem %s1974_s19, %s1784_s30 }
  0x9b PF: > { %s1017_s6 = sshll.u32 %s1454_s13, 2 }
  0x9c   : > { %s450_s23 = sadd.s32 %s1450_s12, %s1017_s6 }
  0x9d   : > { %s451_s4 = sld [smem:[#allocation4 + %s450_s23]] }
  0xa3   : > { %p1018_p6 = scmp.le.s32.totalorder %s451_s4, 0 }
  0xa4   : > { %v1213_v1 = vld [vmem:[%s1745_s28 + $0x4] ss:$8 sps:$4 sm:$0xff] (!%p1018_p6)   ;;  %v1215_v2 = vld [vmem:[%s1745_s28] ss:$8 sps:$4 sm:$0xff] (!%p1018_p6)   ;;  %v1481_v3 = vmov (!%p1018_p6), 0   ;;  %v1241_v16 = vld [vmem:[%s1751_s10 + $0x50] sm:$0xff] (!%p1018_p6)   ;;  %v475_v35 = vlaneseq (!%p1018_p6) }
  0xa5   : > { %455 = sbr.rel (%p1018_p6) target bundleno = 779 (0x30b), region = 60  ;;  %597 = vmatprep.mubr.bf16.mxu0 (!%p1018_p6), %v1481_v3  ;;  %565 = vmatprep.subr.bf16.mxu0 (!%p1018_p6), %v1213_v1  ;;  %v1216_v4 = vld [vmem:[%s1745_s28 + $0x14] ss:$8 sps:$4 sm:$0xff] (!%p1018_p6)   ;;  %v1218_v5 = vld [vmem:[%s1745_s28 + $0x10] ss:$8 sps:$4 sm:$0xff] (!%p1018_p6)   ;;  %v1237_v11 = vld [vmem:[%s1751_s10 + $0x40] sm:$0xff] (!%p1018_p6)  }
  0xa6   : > { %566 = vmatpush1.bf16.msra.mxu0 (!%p1018_p6), %v1215_v2  ;;  %v1219_v6 = vld [vmem:[%s1745_s28 + $0x24] ss:$8 sps:$4 sm:$0xff] (!%p1018_p6)   ;;  %v1221_v7 = vld [vmem:[%s1745_s28 + $0x20] ss:$8 sps:$4 sm:$0xff] (!%p1018_p6)   ;;  %v1222_v8 = vld [vmem:[%s1745_s28 + $0x34] ss:$8 sps:$4 sm:$0xff] (!%p1018_p6)   ;;  %1059 = vmatprep.subr.bf16.mxu1 (!%p1018_p6), %v1237_v11 }
  0xa7   : > { %567 = vmatprep.subr.bf16.mxu0 (!%p1018_p6), %v1216_v4  ;;  %v1224_v9 = vld [vmem:[%s1745_s28 + $0x30] ss:$8 sps:$4 sm:$0xff] (!%p1018_p6)   ;;  %v1225_v10 = vld [vmem:[%s1745_s28 + $0x44] ss:$8 sps:$4 sm:$0xff] (!%p1018_p6)   ;;  %v1227_v13 = vld [vmem:[%s1745_s28 + $0x40] ss:$8 sps:$4 sm:$0xff] (!%p1018_p6)  }
  0xa8   : > { %v1238_v12 = vld [vmem:[%s1751_s10] sm:$0xff] (!%p1018_p6)   ;;  %v1239_v14 = vld [vmem:[%s1751_s10 + $0x48] sm:$0xff] (!%p1018_p6)   ;;  %v1228_v17 = vld [vmem:[%s1745_s28 + $0x54] ss:$8 sps:$4 sm:$0xff] (!%p1018_p6)   ;;  %v476_v36 = vshrl.u32 (!%p1018_p6), %v475_v35, 7  ;;  %p1051_p7 = scmp.ne.s32.totalorder (!%p1018_p6), %s1446_s11, 0 }
  0xa9   : > { %1060 = vmatpush3.bf16.msra.mxu1 (!%p1018_p6), %v1238_v12  ;;  %v1240_v15 = vld [vmem:[%s1751_s10 + $0x8] sm:$0xff] (!%p1018_p6)   ;;  %v1230_v18 = vld [vmem:[%s1745_s28 + $0x50] ss:$8 sps:$4 sm:$0xff] (!%p1018_p6)   ;;  %v1234_v23 = vld [vmem:[%s1745_s28 + $0x74] ss:$8 sps:$4 sm:$0xff] (!%p1018_p6)  }
  0xaa   : > { %568 = vmatpush1.bf16.msra.mxu0 (!%p1018_p6), %v1218_v5  ;;  %1061 = vmatprep.subr.bf16.mxu1 (!%p1018_p6), %v1239_v14  ;;  %v1242_v19 = vld [vmem:[%s1751_s10 + $0x10] sm:$0xff] (!%p1018_p6)   ;;  %v1243_v20 = vld [vmem:[%s1751_s10 + $0x58] sm:$0xff] (!%p1018_p6)   ;;  %v1231_v21 = vld [vmem:[%s1745_s28 + $0x64] ss:$8 sps:$4 sm:$0xff] (!%p1018_p6)   ;;  %v477_v37 = vsub.s32 (!%p1018_p6), 0, %v476_v36  ;;  %v481_v39 = vsub.s32 (!%p1018_p6), 1, %v476_v36 }
  0xab   : > { %569 = vmatprep.subr.bf16.mxu0 (!%p1018_p6), %v1219_v6  ;;  %v1233_v22 = vld [vmem:[%s1745_s28 + $0x60] ss:$8 sps:$4 sm:$0xff] (!%p1018_p6)   ;;  %v1244_v24 = vld [vmem:[%s1751_s10 + $0x18] sm:$0xff] (!%p1018_p6)   ;;  %v1249_v31 = vld [vmem:[%s1751_s10 + $0x70] sm:$0xff] (!%p1018_p6)  }
  0xac   : > { %v1245_v25 = vld [vmem:[%s1751_s10 + $0x60] sm:$0xff]   ;;  %v1236_v27 = vld [vmem:[%s1745_s28 + $0x70] ss:$8 sps:$4 sm:$0xff]   ;;  %v1247_v28 = vld [vmem:[%s1751_s10 + $0x68] sm:$0xff]  }
  0xad   : > { %1062 = vmatpush3.bf16.msra.mxu1 %v1240_v15  ;;  %v1246_v26 = vld [vmem:[%s1751_s10 + $0x20] sm:$0xff]   ;;  %v1248_v29 = vld [vmem:[%s1751_s10 + $0x28] sm:$0xff]   ;;  %v456_v30 = vld [vmem:[%s1771_s8] sm:$0xf] }
  0xae   : > { %570 = vmatpush1.bf16.msra.mxu0 %v1221_v7  ;;  %1063 = vmatprep.subr.bf16.mxu1 %v1241_v16  ;;  %v1250_v32 = vld [vmem:[%s1751_s10 + $0x30] sm:$0xff]   ;;  %v1251_v33 = vld [vmem:[%s1751_s10 + $0x78] sm:$0xff]  }
  0xaf   : > { %571 = vmatprep.subr.bf16.mxu0 %v1222_v8  ;;  %v1252_v34 = vld [vmem:[%s1751_s10 + $0x38] sm:$0xff]  }
  0xb0   : > { %v473_v38 = vld [vmem:[%s435_s0] sm:$0x3] }
  0xb1   : > { %1064 = vmatpush3.bf16.msra.mxu1 %v1242_v19  ;;  %v478_v40 = vrot.slane %v473_v38, %v477_v37  ;;  %v482_v41 = vrot.slane %v473_v38, %v481_v39 }
  0xb2   : > { %572 = vmatpush1.bf16.msra.mxu0 %v1224_v9  ;;  %1065 = vmatprep.subr.bf16.mxu1 %v1243_v20 }
  0xb3   : > { %573 = vmatprep.subr.bf16.mxu0 %v1225_v10 }
  0xb5   : > { %1066 = vmatpush3.bf16.msra.mxu1 %v1244_v24 }
  0xb6   : > { %574 = vmatpush1.bf16.msra.mxu0 %v1227_v13  ;;  %1067 = vmatprep.subr.bf16.mxu1 %v1245_v25 }
  0xb7   : > { %575 = vmatprep.subr.bf16.mxu0 %v1228_v17 }
  0xb9   : > { %1068 = vmatpush3.bf16.msra.mxu1 %v1246_v26 }
  0xba   : > { %576 = vmatpush1.bf16.msra.mxu0 %v1230_v18  ;;  %1069 = vmatprep.subr.bf16.mxu1 %v1247_v28 }
  0xbb   : > { %577 = vmatprep.subr.bf16.mxu0 %v1231_v21 }
  0xbd   : > { %1070 = vmatpush3.bf16.msra.mxu1 %v1248_v29 }
  0xbe   : > { %578 = vmatpush1.bf16.msra.mxu0 %v1233_v22  ;;  %1071 = vmatprep.subr.bf16.mxu1 %v1249_v31 }
  0xbf   : > { %579 = vmatprep.subr.bf16.mxu0 %v1234_v23 }
  0xc1   : > { %1072 = vmatpush3.bf16.msra.mxu1 %v1250_v32 }
  0xc2   : > { %580 = vmatpush1.bf16.msra.mxu0 %v1236_v27  ;;  %1073 = vmatprep.subr.bf16.mxu1 %v1251_v33 }
  0xc5   : > { %598 = vmatmul.mubr.bf16.vlgmr.msra.gmra.mrb[0].mxu0 %v456_v30  ;;  %1074 = vmatpush3.bf16.msra.mxu1 %v1252_v34 }
 0x198   : > { %v599_v42 = vpop.f32.mrb[0].mxu0 }
 0x199   : > { %v600_v43 = vadd.f32 %v599_v42, %v478_v40  ;;  %v601_v44 = vpop.f32.mrb[1].mxu0 }
 0x19a   : > { %v602_v45 = vadd.f32 %v601_v44, %v482_v41  ;;  %v603_v46 = vpop.f32.mrb[2].mxu0 }
 0x19b   : > { %v606_v47 = vmax.f32 %v600_v43, 0.0  ;;  %v604_v48 = vpop.f32.mrb[3].mxu0 }
 0x19c   : > { %v607_v49 = vmax.f32 %v602_v45, 0.0 }
 0x19d   : > { %v608_v51 = vpack.c.bf16 %v606_v47, %v606_v47 }
 0x19e   : > { %v609_v50 = vpack.c.bf16 %v607_v49, %v607_v49 }
 0x1a0   : > { %770 = vmatprep.mubr.bf16.mxu1 %v609_v50 }
 0x1a1   : > { %771 = vmatmul.mubr.bf16.vlgmr.msra.gmra.mrb[0].mxu1 %v608_v51 }
 0x271   : > { %780 = sbr.rel (%p1051_p7) target bundleno = 633 (0x279), region = 64 }
 0x274   : > { %v1075_v52 = vpop.f32.mrb[0].mxu1 }
 0x275   : > { %v1076_v53 = vpop.f32.mrb[1].mxu1 }
 0x276   : > { %v1077_v54 = vadd.f32 %v1076_v53, %v1075_v52  ;;  %v1078_v55 = vpop.f32.mrb[2].mxu1 }
 0x277   : > { %v1079_v56 = vpop.f32.mrb[3].mxu1 }
 0x278   : > { %781 = vst [vmem:[#allocation2] sm:$0xff] %v1077_v54 }
 0x279 PF: > { %785 = sbr.rel (%p443_p2) target bundleno = 643 (0x283), region = 68 }
 0x27f   : > { %v786_v57 = vld [vmem:[#allocation2] sm:$0xff] (!%p443_p2) }
 0x280   : > { %v787_v58 = vadd.f32 %v1077_v54, %v786_v57 }
 0x282   : > { %788 = vst [vmem:[#allocation2] sm:$0xff] %v787_v58 }
 0x283 PF: > { %p1053_p4 = scmp.ne.s32.totalorder %s1446_s11, 1 }
 0x284   : > { %v794_v59 = vld [vmem:[%s1776_s25] sm:$0xff] (!%p1053_p4)  ;;  %v1482_v60 = vmov (!%p1053_p4), 0   ;;  %v793_v1 = vld [vmem:[%s1793_s24] sm:$0xff] (!%p1053_p4) }
 0x285   : > { %792 = sbr.rel (%p1053_p4) target bundleno = 779 (0x30b), region = 72  ;;  %1253 = vset.pattern.permute.xlu0 (!%p1053_p4), %v1482_v60  ;;  %v1054_v62 = vld [vmem:[%s440_s5] ss:$0 sm:$0xff] (!%p1053_p4) }
 0x286   : > { %806 = vperm.xlu0 (!%p1053_p4), %1253, %v794_v59  }
 0x289   : > { %v795_v61 = vld [vmem:[#allocation2] sm:$0xff] (!%p1053_p4) }
 0x28a   : > { %v803_v63 = vadd.f32 (!%p1053_p4), %v1054_v62, %v795_v61 }
 0x305   : > { %v807_v0 = vpop.permute.xlu0 %806 }
 0x306   : > { %v809_v2 = vmul.f32 %v807_v0, %v803_v63 }
 0x308   : > { %v810_v3 = vadd.f32 %v809_v2, %v793_v1 }
 0x30a   : > { %811 = vst [vmem:[%s1793_s24] sm:$0xff] %v810_v3 }
 0x30b PF: > { %s1977_s11 = sld [smem:[#allocation24_spill]]  ;;  %s1056_s16 = sshll.u32 %s1454_s13, 7 }
 0x30c   : > { %s1978_s3 = sld [smem:[#allocation30_spill]]  ;;  %s826_s20 = sshll.u32 %s1793_s24, 4  ;;  %s827_s20 = int_to_ptr.vmem [resolvable:$true] %s826_s20 }
 0x30d   : > { %s1979_s5 = sand.u32 1, %s1426_s29   ;;  %s1326_s27 = scalar_lea.vmem %s827_s20, 128 }
 0x30e   : > { %s813_s30 = scalar_lea.sflag [#allocation7], %s1979_s5  ;;  %p1327_p5 = scmp.ne.s32.totalorder %s827_s20, %s1326_s27 }
 0x30f   : > { %s1483_s21 = smov [#allocation10]  }
 0x310   : > { %s1330_s19 = sshll.u32 %s1483_s21, 4  ;;  %s1331_s19 = int_to_ptr.vmem [resolvable:$false] %s1330_s19 }
 0x311   : > { %p1980_p11 = scmp.ne.s32.totalorder %s1977_s11, 0  ;;  %s1332_s0 = scalar_lea.vmem %s1331_s19, 256 }
 0x312   : > { %s1852_s18 = scalar_lea.hbm %s1978_s3, %s1056_s16  ;;  %p1333_p12 = scmp.lt.s32.totalorder %s827_s20, %s1331_s19 }
 0x313   : > { %p1328_p0 = pnand %p1327_p5, %p1980_p11  ;;  %p1334_p9 = scmp.lt.s32.totalorder %s1332_s0, %s1326_s27 }
 0x315   : > { %p1329_p10 = pneg %p1328_p0  ;;  %p1335_p13 = por %p1334_p9, %p1333_p12 }
 0x317   : > { %p1336_p1 = pnand %p1335_p13, %p1329_p10 }
 0x319   : > { %1339 = shalt.err (!%p1336_p1)
}
 0x31a   : > { %s1340_s13 = scalar_lea.hbm %s1852_s18, 128  ;;  %s1344_s23 = scalar_lea.hbm %s1978_s3, 256 }
 0x31b   : > { %p1341_p8 = scmp.ne.s32.totalorder %s1852_s18, %s1340_s13  ;;  %p1345_p6 = scmp.lt.u32.totalorder %s1852_s18, %s1978_s3 }
 0x31c   : > { %p1346_p7 = scmp.lt.u32.totalorder %s1344_s23, %s1340_s13  ;;  %p1348_p5 = scmp.lt.u32.totalorder %s1340_s13, %s1852_s18 }
 0x31d   : > { %p1342_p2 = pnand %p1341_p8, %p1980_p11 }
 0x31e   : > { %p1347_p4 = por %p1346_p7, %p1345_p6 }
 0x31f   : > { %p1343_p3 = pneg %p1342_p2 }
 0x320   : > { %p1349_p0 = por %p1348_p5, %p1347_p4 }
 0x322   : > { %p1350_p10 = pnand %p1349_p0, %p1343_p3 }
 0x324   : > { %1353 = shalt.err (!%p1350_p10)
}
 0x325   : > { %1085 = dma.vmem_to_hbm [thread:$0]  (%p1980_p11), %s827_s20, 128, %s1852_s18, %s813_s30  }
 0x326 PF: > { %s1981_s28 = sld [smem:[#allocation15_spill]]  ;;  %s1982_s26 = sld [smem:[#allocation25_spill]] }
 0x327   : > { %p1099_p12 = scmp.ge.s32.totalorder %s1470_s17, 2 }
 0x32c   : > { %s838_s10 = sand.u32 1, %s1981_s28   ;;  %p1983_p9 = scmp.ne.s32.totalorder %s1982_s26, 0 }
 0x32d   : > { %s839_s8 = scalar_lea.sflag [#allocation7], %s838_s10 }
 0x32e   : > { %p1095_p13 = pnand %p1099_p12, %p1983_p9 }
 0x330   : > { %1417 = dma.done.wait (!%p1095_p13), %s839_s8, 128  }
 0x331   : > { %1419 = vsyncadd (!%p1095_p13), %s839_s8, 4294967168  ;;  %s32_s17 = sadd.s32 1, %s1470_s17   ;;  %s1985_s11 = sld [smem:[#allocation16_spill]] }
 0x332   : > { %p1879_p1 = scmp.ge.s32.totalorder %s32_s17, 18   ;;  %s1986_s30 = sld [smem:[#allocation23_spill]] }
 0x333   : > { %s1987_s16 = sld [smem:[#allocation17_spill]]  ;;  %s1988_s10 = sld [smem:[#allocation22_spill]] }
 0x334   : > { %s1989_s13 = sld [smem:[#allocation18_spill]]  ;;  %s1990_s25 = sld [smem:[#allocation19_spill]] }
 0x335   : > { %s1991_s22 = sld [smem:[#allocation20_spill]]  ;;  %s1992_s18 = sld [smem:[#allocation21_spill]] }
 0x336   : > { %s1993_s0 = smov %s1426_s29  ;;  %s1995_s8 = smov %s1438_s9 }
 0x337   : > { %s1994_s29 = smov %s1985_s11  ;;  %s1997_s11 = smov %s1458_s14 }
 0x338   : > { %s1998_s12 = smov %s1462_s15  ;;  %31 = sbr.rel (!%p1879_p1) target bundleno = 29 (0x1d), region = 134 }
 0x339   : > { %s1996_s9 = smov %s1987_s16 }
 0x33a   : > { %s1999_s14 = smov %s1990_s25 }
 0x33b   : > { %s2000_s15 = smov %s1991_s22  ;;  %s2001_s16 = smov %s1992_s18 }
 0x33f   :  { %844 = vsyncpa [#allocation6], 1 }
 0x340   :  { %846 = vsyncpa [#allocation6 + $0x1], 1 }
 0x341   :  { %847 = vsyncpa [#allocation9], 1 }
 0x342   :  { %849 = vsyncpa [#allocation9 + $0x1], 1 }
 0x343   :  { %850 = vsyncpa [#allocation7], 1 }
 0x344   :  { %852 = vsyncpa [#allocation7 + $0x1], 1 }

</bundles_post_ra>
